<compile_context>
chip_gen: v7x
topology: tpu7x:2x2x1
jax: 0.10.0
libtpu: 0.0.40
codegen_flags: <defaults>
</compile_context>

<pallas_src>
import jax
import jax.numpy as jnp
from jax.experimental import pallas as pl
from jax.experimental.pallas import tpu as pltpu


def _round_up(x, m):
    return ((x + m - 1) // m) * m


def _cdiv(a, b):
    return -(-a // b)


def _vmem_capacity_bytes(default=64 * 1024 * 1024):
    # Conservative fallback (assume the small v7x VMEM) if the query is unavailable.
    try:
        return int(getattr(pltpu.get_tpu_info(), "vmem_capacity_bytes", default))
    except Exception:
        return default


def _make_local_decoder_kernel(n_blocks, fold, rows_total, needs_mask):
    """Fused fc_1 + leaky_relu + n_blocks x ResnetBlockFC + fc, on one row tile."""

    def kernel(*refs):
        x_ref = refs[0]                       # (tile_m, d_in)      compute dtype (bf16)
        o_ref = refs[-1]                      # (dop, tile_m/fold)  f32, lane-dense
        w1_ref, b1_ref = refs[1], refs[2]     # fc_1 : (fold*d_in, fold*hid), (1, fold*hid)
        wf_ref, bf_ref = refs[-3], refs[-2]   # fc   : (fold*hid, dop),       (1, dop)
        blk_refs = refs[3:-3]                 # 4 refs per ResnetBlockFC

        cdt = w1_ref.dtype
        tile_m, d_in = x_ref.shape
        tmf = tile_m // fold

        xblk = x_ref[...]
        if needs_mask:
            # Partial last block: OOB rows hold unspecified bits. With fold > 1 a NaN/Inf
            # garbage row would leak into the *other* fold group's columns via NaN*0 in
            # the block-diagonal matmul, so zero those rows explicitly.
            rows_left = rows_total - pl.program_id(0) * tile_m
            rid = jax.lax.broadcasted_iota(jnp.int32, (tile_m, d_in), 0)
            xblk = jnp.where(rid < rows_left, xblk, jnp.zeros_like(xblk))

        # fc_1: each fold group multiplies its row slice by its (zero-embedded) weight
        # rows; summing assembles a dense (tmf, fold*hid) activation without any lane
        # concatenation.  leaky_relu(0.2) == max(h, 0.2*h) since the slope is in (0, 1).
        h = None
        for g in range(fold):
            part = jnp.dot(xblk[g * tmf:(g + 1) * tmf, :],
                           w1_ref[g * d_in:(g + 1) * d_in, :],
                           preferred_element_type=jnp.float32)
            h = part if h is None else h + part
        h = h + b1_ref[...]
        h = jnp.maximum(h, 0.2 * h)

        # ResnetBlockFC: net = fc_0(relu(h)); dx = fc_1(relu(net)); h = h + dx.
        # Block-diagonal weights keep the fold groups independent; residual math in f32.
        for i in range(n_blocks):
            w0, b0, w1b, b1b = blk_refs[4 * i: 4 * i + 4]
            net = jnp.dot(jnp.maximum(h, 0.0).astype(cdt), w0[...],
                          preferred_element_type=jnp.float32) + b0[...]
            dx = jnp.dot(jnp.maximum(net, 0.0).astype(cdt), w1b[...],
                         preferred_element_type=jnp.float32) + b1b[...]
            h = h + dx

        # Final fc -> (tmf, dop) with dop = fold*d_out padded to 8 sublanes, then one
        # small transpose so rows land on lanes: full-width (dop, tmf) stores.
        out = jnp.dot(h.astype(cdt), wf_ref[...],
                      preferred_element_type=jnp.float32) + bf_ref[...]
        o_ref[...] = out.T.astype(o_ref.dtype)

    return kernel


def prepare_params(params, *, compute_dtype=jnp.bfloat16):
    """One-time layout/dtype prep of the PyTorch-style weights.

    Returns (weights_tuple, meta). Call once and reuse across forward calls so the
    per-call dispatch is free of the small transpose/cast/block-diag ops.
    """
    hid, d_in = params["fc1_w"].shape              # PyTorch Linear stores (out, in)
    d_out = params["fc_w"].shape[0]
    n_blocks = sum(1 for k in params if k.startswith("blk") and k.endswith("_w0"))

    # Fold `fold` independent row groups onto the 128-lane axis when hidden_dim < 128,
    # so every intermediate vreg is lane-dense (hid=64 -> fold=2 -> width 128).
    fold = 1 if hid >= 128 else max(1, 128 // hid)
    dop = _round_up(fold * d_out, 8)               # 8-sublane-aligned output slab

    def t(w):                                      # (out,in) -> (in,out), compute dtype
        return jnp.asarray(w, jnp.float32).T.astype(compute_dtype)

    def blockdiag(w_t):                            # (i,o) -> (fold*i, fold*o)
        if fold == 1:
            return w_t
        i, o = w_t.shape
        out = jnp.zeros((fold * i, fold * o), w_t.dtype)
        for g in range(fold):
            out = out.at[g * i:(g + 1) * i, g * o:(g + 1) * o].set(w_t)
        return out

    def bias(b, pad_to=None):                      # tiled fold times, f32 (1, K)
        b = jnp.tile(jnp.asarray(b, jnp.float32).reshape(1, -1), (1, fold))
        if pad_to is not None and b.shape[1] < pad_to:
            b = jnp.pad(b, ((0, 0), (0, pad_to - b.shape[1])))
        return b

    args = [blockdiag(t(params["fc1_w"])), bias(params["fc1_b"])]
    for i in range(n_blocks):
        args += [blockdiag(t(params[f"blk{i}_w0"])), bias(params[f"blk{i}_b0"]),
                 blockdiag(t(params[f"blk{i}_w1"])), bias(params[f"blk{i}_b1"])]
    wf = blockdiag(t(params["fc_w"]))
    if wf.shape[1] < dop:
        wf = jnp.pad(wf, ((0, 0), (0, dop - wf.shape[1])))
    args += [wf, bias(params["fc_b"], pad_to=dop)]

    meta = dict(n_blocks=n_blocks, d_in=d_in, hidden=hid, d_out=d_out,
                fold=fold, dop=dop, compute_dtype=compute_dtype)
    return tuple(args), meta


def local_decoder_forward(x, weights, meta, *, tile_m=1024):
    """x: [B, N, input_dim] -> [B, N, output_dim] (float32)."""
    B, N, d_in = x.shape
    assert d_in == meta["d_in"], "input_dim mismatch vs prepared params"
    fold, dop, d_out = meta["fold"], meta["dop"], meta["d_out"]
    hid, n_blocks = meta["hidden"], meta["n_blocks"]
    cdt = meta["compute_dtype"]
    M = B * N

    # ---- tile size --------------------------------------------------------------
    # Granularity: `fold` row groups of 128 rows each keeps the lane-dense output
    # block (dop, tile_m/fold) a multiple of 128 lanes.
    gran = 128 * fold
    # Cap at ~M/2 so there are >=2 grid tiles whenever possible: the "parallel" grid
    # axis then lands work on both v7x TensorCores (no cost on single-TC v5e/v6e).
    tile_m = max(gran, _round_up(min(int(tile_m), max(_cdiv(M, 2), 1)), gran))

    # Generation-aware VMEM budget: ~1/2 of per-core VMEM (v7x: 64 MiB -> 32 MiB,
    # v5e/v6e: 128 MiB -> 64 MiB); shrink the tile until the estimate fits.
    vmem_limit = max(16 << 20, min(_vmem_capacity_bytes() // 2, 64 << 20))
    w_bytes = sum(int(w.size) * w.dtype.itemsize for w in weights)
    in_item = jnp.dtype(cdt).itemsize
    width = max(fold * hid, dop, 128)

    def vmem_est(tm):
        tmf = tm // fold
        return (2 * tm * d_in * in_item        # double-buffered input block
                + 2 * dop * tmf * 4            # double-buffered output block (f32)
                + 2 * w_bytes                  # resident (possibly 2x-buffered) weights
                + 6 * tmf * width * 4)         # live f32 h/net/dx/out intermediates

    while tile_m > gran and vmem_est(tile_m) > (vmem_limit * 3) // 4:
        tile_m -= gran

    num_tiles = _cdiv(M, tile_m)
    tmf = tile_m // fold
    m_folded = num_tiles * tmf                 # padded folded row count

    # ---- inputs -------------------------------------------------------------------
    # Cast once to the bf16 compute dtype (halves the kernel's HBM read + input DMA);
    # no jnp.pad: the last block may read past M, those rows are zero-masked in-kernel
    # and their outputs are sliced off below.
    x2d = x.reshape(M, d_in).astype(cdt)
    needs_mask = (fold > 1) and (M % tile_m != 0)

    in_specs = [pl.BlockSpec((tile_m, d_in), lambda i: (i, 0))]
    # Grid-invariant parameters: full-array blocks with a constant index map stay
    # VMEM-resident across the (per-core sequential) row-tile grid.
    in_specs += [pl.BlockSpec(w.shape, lambda i: (0, 0)) for w in weights]

    out_t = pl.pallas_call(
        _make_local_decoder_kernel(n_blocks, fold, M, needs_mask),
        out_shape=jax.ShapeDtypeStruct((dop, m_folded), jnp.float32),
        grid=(num_tiles,),
        in_specs=in_specs,
        out_specs=pl.BlockSpec((dop, tmf), lambda i: (0, i)),
        compiler_params=pltpu.CompilerParams(
            dimension_semantics=("parallel",),
            vmem_limit_bytes=int(vmem_limit)),
    )(x2d, *weights)

    # ---- un-fold the lane-dense output back to [B, N, d_out] (tiny arrays) ---------
    o = out_t[: fold * d_out]                                    # drop sublane padding
    o = o.reshape(fold, d_out, num_tiles, tmf).transpose(2, 0, 3, 1)
    o = o.reshape(num_tiles * tile_m, d_out)[:M]
    return o.reshape(B, N, d_out)


def init_params(key, input_dim, output_dim, hidden_dim, n_blocks=2):
    """Deterministic synthetic init (uniform, PyTorch-Linear-like fan_in scaling)."""
    def linear(key, out_f, in_f):
        kw, kb = jax.random.split(key)
        bound = 1.0 / jnp.sqrt(in_f)
        w = jax.random.uniform(kw, (out_f, in_f), jnp.float32, -bound, bound)
        b = jax.random.uniform(kb, (out_f,), jnp.float32, -bound, bound)
        return w, b

    keys = jax.random.split(key, 2 + 2 * n_blocks)
    p = {}
    p["fc1_w"], p["fc1_b"] = linear(keys[0], hidden_dim, input_dim)
    for i in range(n_blocks):
        p[f"blk{i}_w0"], p[f"blk{i}_b0"] = linear(keys[1 + 2 * i], hidden_dim, hidden_dim)
        p[f"blk{i}_w1"], p[f"blk{i}_b1"] = linear(keys[2 + 2 * i], hidden_dim, hidden_dim)
    p["fc_w"], p["fc_b"] = linear(keys[1 + 2 * n_blocks], output_dim, hidden_dim)
    return p


def local_decoder_reference(x, p, compute_dtype=jnp.bfloat16):
    """Pure-JAX reference mirroring the kernel numerics (bf16 operands, f32 accumulate)."""
    def lin(h, w, b):
        w_t = jnp.asarray(w, jnp.float32).T.astype(compute_dtype)
        return (jnp.dot(h.astype(compute_dtype), w_t, preferred_element_type=jnp.float32)
                + jnp.asarray(b, jnp.float32))

    n_blocks = sum(1 for k in p if k.startswith("blk") and k.endswith("_w0"))
    h = lin(x, p["fc1_w"], p["fc1_b"])
    h = jnp.where(h > 0, h, 0.2 * h)                # leaky_relu(0.2)
    for i in range(n_blocks):
        net = lin(jnp.maximum(h, 0.0), p[f"blk{i}_w0"], p[f"blk{i}_b0"])
        dx = lin(jnp.maximum(net, 0.0), p[f"blk{i}_w1"], p[f"blk{i}_b1"])
        h = h + dx
    return lin(h, p["fc_w"], p["fc_b"])


if __name__ == "__main__":
    # Small shapes: batch=2, n_points=120 (deliberately NOT a multiple of the tile
    # granularity, exercising the partial-block + in-kernel mask path), input_dim=16,
    # hidden=64 (module default -> fold=2 lane-folding), output_dim=4, n_blocks=2.
    B, N, D_IN, HID, D_OUT, N_BLOCKS = 2, 120, 16, 64, 4, 2

    key = jax.random.PRNGKey(0)
    kx, kp = jax.random.split(key)
    x = jax.random.normal(kx, (B, N, D_IN), jnp.float32)
    params = init_params(kp, D_IN, D_OUT, HID, N_BLOCKS)

    # One-time weight prep, cached outside the per-call jit path.
    weights, meta = prepare_params(params)
    fwd = jax.jit(lambda xx, ww: local_decoder_forward(xx, ww, meta))
    out = jax.block_until_ready(fwd(x, weights))

    ref = local_decoder_reference(x, params)
    assert out.shape == (B, N, D_OUT)
    err = float(jnp.max(jnp.abs(out - ref)))
    assert jnp.allclose(out, ref, atol=1e-2, rtol=1e-2), f"mismatch vs reference, max abs err = {err}"

    print("KERNEL_OK")
</pallas_src>

<mosaic_0001>
module attributes {stable_mosaic.version = 11 : i64} {
  func.func @kernel(%arg0: i32, %arg1: memref<256x16xbf16, #tpu.memory_space<vmem>>, %arg2: memref<32x128xbf16, #tpu.memory_space<vmem>>, %arg3: memref<1x128xf32, #tpu.memory_space<vmem>>, %arg4: memref<128x128xbf16, #tpu.memory_space<vmem>>, %arg5: memref<1x128xf32, #tpu.memory_space<vmem>>, %arg6: memref<128x128xbf16, #tpu.memory_space<vmem>>, %arg7: memref<1x128xf32, #tpu.memory_space<vmem>>, %arg8: memref<128x128xbf16, #tpu.memory_space<vmem>>, %arg9: memref<1x128xf32, #tpu.memory_space<vmem>>, %arg10: memref<128x128xbf16, #tpu.memory_space<vmem>>, %arg11: memref<1x128xf32, #tpu.memory_space<vmem>>, %arg12: memref<128x8xbf16, #tpu.memory_space<vmem>>, %arg13: memref<1x8xf32, #tpu.memory_space<vmem>>, %arg14: memref<8x128xf32, #tpu.memory_space<vmem>>) attributes {dimension_semantics = [#tpu.dimension_semantics<parallel>], iteration_bounds = array<i64: 1>, scalar_prefetch = 0 : i64, scratch_operands = 0 : i64, tpu.core_type = #tpu.core_type<tc>, window_params = [{transform_indices = @transform_0, window_bounds = array<i64: 256, 16>}, {pipeline_mode = #tpu.pipeline_mode<synchronous>, transform_indices = @transform_1, window_bounds = array<i64: 32, 128>}, {pipeline_mode = #tpu.pipeline_mode<synchronous>, transform_indices = @transform_2, window_bounds = array<i64: 1, 128>}, {pipeline_mode = #tpu.pipeline_mode<synchronous>, transform_indices = @transform_3, window_bounds = array<i64: 128, 128>}, {pipeline_mode = #tpu.pipeline_mode<synchronous>, transform_indices = @transform_4, window_bounds = array<i64: 1, 128>}, {pipeline_mode = #tpu.pipeline_mode<synchronous>, transform_indices = @transform_5, window_bounds = array<i64: 128, 128>}, {pipeline_mode = #tpu.pipeline_mode<synchronous>, transform_indices = @transform_6, window_bounds = array<i64: 1, 128>}, {pipeline_mode = #tpu.pipeline_mode<synchronous>, transform_indices = @transform_7, window_bounds = array<i64: 128, 128>}, {pipeline_mode = #tpu.pipeline_mode<synchronous>, transform_indices = @transform_8, window_bounds = array<i64: 1, 128>}, {pipeline_mode = #tpu.pipeline_mode<synchronous>, transform_indices = @transform_9, window_bounds = array<i64: 128, 128>}, {pipeline_mode = #tpu.pipeline_mode<synchronous>, transform_indices = @transform_10, window_bounds = array<i64: 1, 128>}, {pipeline_mode = #tpu.pipeline_mode<synchronous>, transform_indices = @transform_11, window_bounds = array<i64: 128, 8>}, {pipeline_mode = #tpu.pipeline_mode<synchronous>, transform_indices = @transform_12, window_bounds = array<i64: 1, 8>}, {transform_indices = @transform_13, window_bounds = array<i64: 8, 128>}]} {
    %c0 = arith.constant 0 : index
    %c0_0 = arith.constant 0 : index
    %0 = vector.load %arg1[%c0, %c0_0] : memref<256x16xbf16, #tpu.memory_space<vmem>>, vector<256x16xbf16>
    %c256_i32 = arith.constant 256 : i32
    %1 = arith.muli %arg0, %c256_i32 : i32
    %c240_i32 = arith.constant 240 : i32
    %2 = arith.subi %c240_i32, %1 : i32
    %3 = tpu.iota {dimensions = array<i32: 0>} : vector<256x16xi32>
    %4 = vector.broadcast %2 : i32 to vector<256x16xi32>
    %5 = arith.cmpi slt, %3, %4 : vector<256x16xi32>
    %cst = arith.constant 0.000000e+00 : bf16
    %6 = vector.broadcast %cst : bf16 to vector<256x16xbf16>
    %7 = arith.select %5, %0, %6 : vector<256x16xi1>, vector<256x16xbf16>
    %8 = vector.extract_strided_slice %7 {offsets = [0, 0], sizes = [128, 16], strides = [1, 1]} : vector<256x16xbf16> to vector<128x16xbf16>
    %c0_1 = arith.constant 0 : index
    %c0_2 = arith.constant 0 : index
    %9 = vector.load %arg2[%c0_1, %c0_2] : memref<32x128xbf16, #tpu.memory_space<vmem>>, vector<16x128xbf16>
    %cst_3 = arith.constant dense<0.000000e+00> : vector<128x128xf32>
    %10 = tpu.matmul %8, %9, %cst_3 {dimension_numbers = #tpu.dot_dimension_numbers<[1], [0], [0], [1], [0, 0, 1, 1], [], []>} : vector<128x16xbf16>, vector<16x128xbf16>, vector<128x128xf32> -> vector<128x128xf32>
    %11 = vector.extract_strided_slice %7 {offsets = [128, 0], sizes = [128, 16], strides = [1, 1]} : vector<256x16xbf16> to vector<128x16xbf16>
    %c16 = arith.constant 16 : index
    %c0_4 = arith.constant 0 : index
    %12 = vector.load %arg2[%c16, %c0_4] : memref<32x128xbf16, #tpu.memory_space<vmem>>, vector<16x128xbf16>
    %cst_5 = arith.constant dense<0.000000e+00> : vector<128x128xf32>
    %13 = tpu.matmul %11, %12, %cst_5 {dimension_numbers = #tpu.dot_dimension_numbers<[1], [0], [0], [1], [0, 0, 1, 1], [], []>} : vector<128x16xbf16>, vector<16x128xbf16>, vector<128x128xf32> -> vector<128x128xf32>
    %14 = arith.addf %10, %13 : vector<128x128xf32>
    %c0_6 = arith.constant 0 : index
    %c0_7 = arith.constant 0 : index
    %15 = vector.load %arg3[%c0_6, %c0_7] : memref<1x128xf32, #tpu.memory_space<vmem>>, vector<1x128xf32>
    %16 = vector.broadcast %15 : vector<1x128xf32> to vector<128x128xf32>
    %17 = arith.addf %14, %16 : vector<128x128xf32>
    %cst_8 = arith.constant 2.000000e-01 : f32
    %18 = vector.broadcast %cst_8 : f32 to vector<128x128xf32>
    %19 = arith.mulf %18, %17 : vector<128x128xf32>
    %20 = arith.maximumf %17, %19 : vector<128x128xf32>
    %cst_9 = arith.constant 0.000000e+00 : f32
    %21 = vector.broadcast %cst_9 : f32 to vector<128x128xf32>
    %22 = arith.maximumf %20, %21 : vector<128x128xf32>
    %23 = arith.truncf %22 : vector<128x128xf32> to vector<128x128xbf16>
    %c0_10 = arith.constant 0 : index
    %c0_11 = arith.constant 0 : index
    %24 = vector.load %arg4[%c0_10, %c0_11] : memref<128x128xbf16, #tpu.memory_space<vmem>>, vector<128x128xbf16>
    %cst_12 = arith.constant dense<0.000000e+00> : vector<128x128xf32>
    %25 = tpu.matmul %23, %24, %cst_12 {dimension_numbers = #tpu.dot_dimension_numbers<[1], [0], [0], [1], [0, 0, 1, 1], [], []>} : vector<128x128xbf16>, vector<128x128xbf16>, vector<128x128xf32> -> vector<128x128xf32>
    %c0_13 = arith.constant 0 : index
    %c0_14 = arith.constant 0 : index
    %26 = vector.load %arg5[%c0_13, %c0_14] : memref<1x128xf32, #tpu.memory_space<vmem>>, vector<1x128xf32>
    %27 = vector.broadcast %26 : vector<1x128xf32> to vector<128x128xf32>
    %28 = arith.addf %25, %27 : vector<128x128xf32>
    %cst_15 = arith.constant 0.000000e+00 : f32
    %29 = vector.broadcast %cst_15 : f32 to vector<128x128xf32>
    %30 = arith.maximumf %28, %29 : vector<128x128xf32>
    %31 = arith.truncf %30 : vector<128x128xf32> to vector<128x128xbf16>
    %c0_16 = arith.constant 0 : index
    %c0_17 = arith.constant 0 : index
    %32 = vector.load %arg6[%c0_16, %c0_17] : memref<128x128xbf16, #tpu.memory_space<vmem>>, vector<128x128xbf16>
    %cst_18 = arith.constant dense<0.000000e+00> : vector<128x128xf32>
    %33 = tpu.matmul %31, %32, %cst_18 {dimension_numbers = #tpu.dot_dimension_numbers<[1], [0], [0], [1], [0, 0, 1, 1], [], []>} : vector<128x128xbf16>, vector<128x128xbf16>, vector<128x128xf32> -> vector<128x128xf32>
    %c0_19 = arith.constant 0 : index
    %c0_20 = arith.constant 0 : index
    %34 = vector.load %arg7[%c0_19, %c0_20] : memref<1x128xf32, #tpu.memory_space<vmem>>, vector<1x128xf32>
    %35 = vector.broadcast %34 : vector<1x128xf32> to vector<128x128xf32>
    %36 = arith.addf %33, %35 : vector<128x128xf32>
    %37 = arith.addf %20, %36 : vector<128x128xf32>
    %cst_21 = arith.constant 0.000000e+00 : f32
    %38 = vector.broadcast %cst_21 : f32 to vector<128x128xf32>
    %39 = arith.maximumf %37, %38 : vector<128x128xf32>
    %40 = arith.truncf %39 : vector<128x128xf32> to vector<128x128xbf16>
    %c0_22 = arith.constant 0 : index
    %c0_23 = arith.constant 0 : index
    %41 = vector.load %arg8[%c0_22, %c0_23] : memref<128x128xbf16, #tpu.memory_space<vmem>>, vector<128x128xbf16>
    %cst_24 = arith.constant dense<0.000000e+00> : vector<128x128xf32>
    %42 = tpu.matmul %40, %41, %cst_24 {dimension_numbers = #tpu.dot_dimension_numbers<[1], [0], [0], [1], [0, 0, 1, 1], [], []>} : vector<128x128xbf16>, vector<128x128xbf16>, vector<128x128xf32> -> vector<128x128xf32>
    %c0_25 = arith.constant 0 : index
    %c0_26 = arith.constant 0 : index
    %43 = vector.load %arg9[%c0_25, %c0_26] : memref<1x128xf32, #tpu.memory_space<vmem>>, vector<1x128xf32>
    %44 = vector.broadcast %43 : vector<1x128xf32> to vector<128x128xf32>
    %45 = arith.addf %42, %44 : vector<128x128xf32>
    %cst_27 = arith.constant 0.000000e+00 : f32
    %46 = vector.broadcast %cst_27 : f32 to vector<128x128xf32>
    %47 = arith.maximumf %45, %46 : vector<128x128xf32>
    %48 = arith.truncf %47 : vector<128x128xf32> to vector<128x128xbf16>
    %c0_28 = arith.constant 0 : index
    %c0_29 = arith.constant 0 : index
    %49 = vector.load %arg10[%c0_28, %c0_29] : memref<128x128xbf16, #tpu.memory_space<vmem>>, vector<128x128xbf16>
    %cst_30 = arith.constant dense<0.000000e+00> : vector<128x128xf32>
    %50 = tpu.matmul %48, %49, %cst_30 {dimension_numbers = #tpu.dot_dimension_numbers<[1], [0], [0], [1], [0, 0, 1, 1], [], []>} : vector<128x128xbf16>, vector<128x128xbf16>, vector<128x128xf32> -> vector<128x128xf32>
    %c0_31 = arith.constant 0 : index
    %c0_32 = arith.constant 0 : index
    %51 = vector.load %arg11[%c0_31, %c0_32] : memref<1x128xf32, #tpu.memory_space<vmem>>, vector<1x128xf32>
    %52 = vector.broadcast %51 : vector<1x128xf32> to vector<128x128xf32>
    %53 = arith.addf %50, %52 : vector<128x128xf32>
    %54 = arith.addf %37, %53 : vector<128x128xf32>
    %55 = arith.truncf %54 : vector<128x128xf32> to vector<128x128xbf16>
    %c0_33 = arith.constant 0 : index
    %c0_34 = arith.constant 0 : index
    %56 = vector.load %arg12[%c0_33, %c0_34] : memref<128x8xbf16, #tpu.memory_space<vmem>>, vector<128x8xbf16>
    %cst_35 = arith.constant dense<0.000000e+00> : vector<128x8xf32>
    %57 = tpu.matmul %55, %56, %cst_35 {dimension_numbers = #tpu.dot_dimension_numbers<[1], [0], [0], [1], [0, 0, 1, 1], [], []>} : vector<128x128xbf16>, vector<128x8xbf16>, vector<128x8xf32> -> vector<128x8xf32>
    %c0_36 = arith.constant 0 : index
    %c0_37 = arith.constant 0 : index
    %58 = vector.load %arg13[%c0_36, %c0_37] : memref<1x8xf32, #tpu.memory_space<vmem>>, vector<1x8xf32>
    %59 = vector.broadcast %58 : vector<1x8xf32> to vector<128x8xf32>
    %60 = arith.addf %57, %59 : vector<128x8xf32>
    %61 = tpu.transpose %60, [1, 0] : vector<128x8xf32> -> vector<8x128xf32>
    %c0_38 = arith.constant 0 : index
    %c0_39 = arith.constant 0 : index
    %62 = vector.load %arg14[%c0_38, %c0_39] : memref<8x128xf32, #tpu.memory_space<vmem>>, vector<8x128xf32>
    tpu.vector_store %arg14[%c0_38, %c0_39], %61 {strides = array<i32>} : memref<8x128xf32, #tpu.memory_space<vmem>>, vector<8x128xf32>,
    return
  }
  func.func @transform_0(%arg0: i32) -> (i32, i32) {
    %c0_i32 = arith.constant 0 : i32
    %c0_i32_0 = arith.constant 0 : i32
    return %arg0, %c0_i32 : i32, i32
  }
  func.func @transform_1(%arg0: i32) -> (i32, i32) {
    %c0_i32 = arith.constant 0 : i32
    %c0_i32_0 = arith.constant 0 : i32
    %c0_i32_1 = arith.constant 0 : i32
    return %c0_i32, %c0_i32_0 : i32, i32
  }
  func.func @transform_2(%arg0: i32) -> (i32, i32) {
    %c0_i32 = arith.constant 0 : i32
    %c0_i32_0 = arith.constant 0 : i32
    %c0_i32_1 = arith.constant 0 : i32
    return %c0_i32, %c0_i32_0 : i32, i32
  }
  func.func @transform_3(%arg0: i32) -> (i32, i32) {
    %c0_i32 = arith.constant 0 : i32
    %c0_i32_0 = arith.constant 0 : i32
    %c0_i32_1 = arith.constant 0 : i32
    return %c0_i32, %c0_i32_0 : i32, i32
  }
  func.func @transform_4(%arg0: i32) -> (i32, i32) {
    %c0_i32 = arith.constant 0 : i32
    %c0_i32_0 = arith.constant 0 : i32
    %c0_i32_1 = arith.constant 0 : i32
    return %c0_i32, %c0_i32_0 : i32, i32
  }
  func.func @transform_5(%arg0: i32) -> (i32, i32) {
    %c0_i32 = arith.constant 0 : i32
    %c0_i32_0 = arith.constant 0 : i32
    %c0_i32_1 = arith.constant 0 : i32
    return %c0_i32, %c0_i32_0 : i32, i32
  }
  func.func @transform_6(%arg0: i32) -> (i32, i32) {
    %c0_i32 = arith.constant 0 : i32
    %c0_i32_0 = arith.constant 0 : i32
    %c0_i32_1 = arith.constant 0 : i32
    return %c0_i32, %c0_i32_0 : i32, i32
  }
  func.func @transform_7(%arg0: i32) -> (i32, i32) {
    %c0_i32 = arith.constant 0 : i32
    %c0_i32_0 = arith.constant 0 : i32
    %c0_i32_1 = arith.constant 0 : i32
    return %c0_i32, %c0_i32_0 : i32, i32
  }
  func.func @transform_8(%arg0: i32) -> (i32, i32) {
    %c0_i32 = arith.constant 0 : i32
    %c0_i32_0 = arith.constant 0 : i32
    %c0_i32_1 = arith.constant 0 : i32
    return %c0_i32, %c0_i32_0 : i32, i32
  }
  func.func @transform_9(%arg0: i32) -> (i32, i32) {
    %c0_i32 = arith.constant 0 : i32
    %c0_i32_0 = arith.constant 0 : i32
    %c0_i32_1 = arith.constant 0 : i32
    return %c0_i32, %c0_i32_0 : i32, i32
  }
  func.func @transform_10(%arg0: i32) -> (i32, i32) {
    %c0_i32 = arith.constant 0 : i32
    %c0_i32_0 = arith.constant 0 : i32
    %c0_i32_1 = arith.constant 0 : i32
    return %c0_i32, %c0_i32_0 : i32, i32
  }
  func.func @transform_11(%arg0: i32) -> (i32, i32) {
    %c0_i32 = arith.constant 0 : i32
    %c0_i32_0 = arith.constant 0 : i32
    %c0_i32_1 = arith.constant 0 : i32
    return %c0_i32, %c0_i32_0 : i32, i32
  }
  func.func @transform_12(%arg0: i32) -> (i32, i32) {
    %c0_i32 = arith.constant 0 : i32
    %c0_i32_0 = arith.constant 0 : i32
    %c0_i32_1 = arith.constant 0 : i32
    return %c0_i32, %c0_i32_0 : i32, i32
  }
  func.func @transform_13(%arg0: i32) -> (i32, i32) {
    %c0_i32 = arith.constant 0 : i32
    %c0_i32_0 = arith.constant 0 : i32
    return %c0_i32, %arg0 : i32, i32
  }
}

</mosaic_0001>

<bundles_post_ra>
// kernel: _lambda_.1
= control target key start
LH: loop header
LB: loop body
LE: loop exit
PB: predicated region body
PF: predicated region fallthrough
CT: control target
= control target key end

     0   :  { %18 = vsyncpa [#allocation3], 0  ;;  %s2767_s0 = inlined_call_operand.vmem [shape: bf16[240,16], index: 0, kind: input, shape index: {}]   ;;  %s2768_s1 = inlined_call_operand.hbm [shape: bf16[32,128], index: 1, kind: input, shape index: {}]   ;;  %s2769_s2 = inlined_call_operand.vmem [shape: f32[1,128], index: 2, kind: input, shape index: {}]   ;;  %s2770_s3 = inlined_call_operand.vmem [shape: bf16[128,128], index: 3, kind: input, shape index: {}]   ;;  %s2771_s4 = inlined_call_operand.vmem [shape: f32[1,128], index: 4, kind: input, shape index: {}]   ;;  %s2772_s5 = inlined_call_operand.vmem [shape: bf16[128,128], index: 5, kind: input, shape index: {}]   ;;  %s2773_s6 = inlined_call_operand.vmem [shape: f32[1,128], index: 6, kind: input, shape index: {}]   ;;  %s2774_s7 = inlined_call_operand.vmem [shape: bf16[128,128], index: 7, kind: input, shape index: {}]   ;;  %s2775_s8 = inlined_call_operand.hbm [shape: f32[1,128], index: 8, kind: input, shape index: {}]   ;;  %s2776_s9 = inlined_call_operand.vmem [shape: bf16[128,128], index: 9, kind: input, shape index: {}]   ;;  %s2777_s10 = inlined_call_operand.hbm [shape: f32[1,128], index: 10, kind: input, shape index: {}]   ;;  %s2778_s11 = inlined_call_operand.vmem [shape: bf16[128,8], index: 11, kind: input, shape index: {}]   ;;  %s2779_s12 = inlined_call_operand.vmem [shape: f32[1,8], index: 12, kind: input, shape index: {}]   ;;  %s2780_s13 = inlined_call_operand.vmem [shape: f32[8,128], index: 13, kind: output, shape index: {}]  }
   0x1   :  { %19 = vsyncpa [#allocation5], 0  ;;  %s2164_s25 = smov [#allocation4]   ;;  %s2165_s27 = smov [#allocation2]  }
   0x2   :  { %s52_s26 = sshll.u32 %s2164_s25, 4  ;;  %s27_s28 = sshll.u32 %s2165_s27, 4  ;;  %s53_s26 = int_to_ptr.vmem [resolvable:$true] %s52_s26  ;;  %s2241_s28 = int_to_ptr.vmem [resolvable:$true] %s27_s28 }
   0x3   :  { %s2094_s14 = scalar_lea.hbm %s2775_s8, 16 }
   0x4   :  { %p2095_p0 = scmp.ne.s32.totalorder %s2775_s8, %s2094_s14  ;;  %p2098_p1 = scmp.lt.u32.totalorder %s2094_s14, %s2775_s8 }
   0x6   :  { %p2100_p2 = pnand %p2098_p1, %p2095_p0 }
   0x8   :  { %2103 = shalt.err (!%p2100_p2)
}
   0x9   :  { %s2104_s19 = scalar_lea.vmem %s53_s26, 16  ;;  %s2108_s20 = scalar_lea.vmem %s53_s26, 32 }
   0xa   :  { %p2105_p3 = scmp.ne.s32.totalorder %s53_s26, %s2104_s19  ;;  %p2109_p4 = scmp.lt.s32.totalorder %s53_s26, %s53_s26 }
   0xb   :  { %p2110_p5 = scmp.lt.s32.totalorder %s2108_s20, %s2104_s19 }
   0xd   :  { %p2111_p6 = por %p2110_p5, %p2109_p4 }
   0xf   :  { %p2112_p7 = pnand %p2111_p6, %p2105_p3 }
  0x11   :  { %2115 = shalt.err (!%p2112_p7)
}
  0x12   :  { %55 = dma.hbm_to_vmem [thread:$0]  %s2775_s8, 16, %s53_s26, [#allocation5]  }
  0x13   :  { %s2116_s25 = scalar_lea.hbm %s2768_s1, 256 }
  0x14   :  { %p2117_p8 = scmp.ne.s32.totalorder %s2768_s1, %s2116_s25  ;;  %p2120_p9 = scmp.lt.u32.totalorder %s2116_s25, %s2768_s1 }
  0x16   :  { %p2122_p10 = pnand %p2120_p9, %p2117_p8 }
  0x18   :  { %2125 = shalt.err (!%p2122_p10)
}
  0x19   :  { %s2126_s15 = scalar_lea.vmem %s2241_s28, 256  ;;  %p2131_p12 = scmp.lt.s32.totalorder %s2241_s28, %s2241_s28 }
  0x1a   :  { %p2127_p11 = scmp.ne.s32.totalorder %s2241_s28, %s2126_s15  ;;  %p2132_p13 = scmp.lt.s32.totalorder %s2126_s15, %s2126_s15 }
  0x1c   :  { %p2133_p0 = por %p2132_p13, %p2131_p12 }
  0x1e   :  { %p2134_p1 = pnand %p2133_p0, %p2127_p11 }
  0x20   :  { %2137 = shalt.err (!%p2134_p1)
}
  0x21   :  { %s2166_s8 = smov 64   ;;  %s2167_s26 = smov 4  }
  0x22   :  { %33 = dma.hbm_to_vmem [thread:$0]  %s2768_s1, 256, %s2241_s28, [#allocation3], %s2166_s8, %s2166_s8, %s2167_s26  }
  0x23   :  { %s2168_s18 = smov [#allocation6]   ;;  %s2138_s22 = scalar_lea.hbm %s2777_s10, 16 }
  0x24   :  { %s64_s19 = sshll.u32 %s2168_s18, 4  ;;  %p2139_p2 = scmp.ne.s32.totalorder %s2777_s10, %s2138_s22  ;;  %s65_s19 = int_to_ptr.vmem [resolvable:$true] %s64_s19 }
  0x25   :  { %p2142_p3 = scmp.lt.u32.totalorder %s2138_s22, %s2777_s10 }
  0x27   :  { %p2144_p4 = pnand %p2142_p3, %p2139_p2 }
  0x29   :  { %2147 = shalt.err (!%p2144_p4)
}
  0x2a   :  { %s2148_s29 = scalar_lea.vmem %s65_s19, 16  ;;  %s2152_s1 = scalar_lea.vmem %s65_s19, 32 }
  0x2b   :  { %p2149_p5 = scmp.ne.s32.totalorder %s65_s19, %s2148_s29  ;;  %p2153_p6 = scmp.lt.s32.totalorder %s65_s19, %s65_s19 }
  0x2c   :  { %p2154_p7 = scmp.lt.s32.totalorder %s2152_s1, %s2148_s29 }
  0x2e   :  { %p2155_p8 = por %p2154_p7, %p2153_p6 }
  0x30   :  { %p2156_p9 = pnand %p2155_p8, %p2149_p5 }
  0x32   :  { %2159 = shalt.err (!%p2156_p9)
}
  0x33   :  { %67 = dma.hbm_to_vmem [thread:$0]  %s2777_s10, 16, %s65_s19, [#allocation5]  }
  0x34   :  { %2160 = dma.done.wait [#allocation3], 256  }
  0x35   :  { %2161 = vsyncadd [#allocation3], 4294967040 }
  0x36   :  { %2162 = dma.done.wait [#allocation5], 32  }
  0x37   :  { %2163 = vsyncadd [#allocation5], 4294967264  ;;  %vm2169_vm0 = vmmov 1   ;;  %v2052_v1 = vld [vmem:[#allocation2 + $0x8] sm:$0xff]   ;;  %vm296_vm2 = vcmask 130048   ;;  %v2053_v9 = vld [vmem:[#allocation2] sm:$0xff]  }
  0x38   :  { %vm2284_vm1 = vmpackc.low %vm2169_vm0, %vm2169_vm0  ;;  %v98_v2 = vld [vmem:[%s2767_s0 + $0x40] sm:$0xf]  ;;  %v99_v3 = vld [vmem:[%s2767_s0 + $0x44] sm:$0xf]  ;;  %1833 = vmatprep.subr.bf16.mxu0 %v2052_v1  ;;  %vm2170_vm3 = vmmov 0  }
  0x39   :  { %v100_v4 = vld [vmem:[%s2767_s0 + $0x48] sm:$0xf]  ;;  %v230_v5 = vsel %vm2284_vm1, %v98_v2, 0  ;;  %v231_v6 = vsel %vm2284_vm1, %v99_v3, 0  ;;  %v101_v7 = vld [vmem:[%s2767_s0 + $0x4c] sm:$0xf]  ;;  %1834 = vmatpush3.bf16.msra.mxu0 %v2052_v1  ;;  %vm2360_vm4 = vmpackc.low %vm2170_vm3, %vm2170_vm3 }
  0x3a   :  { %v232_v8 = vsel %vm2284_vm1, %v100_v4, 0  ;;  %v1655_v10 = vcombine.low %v230_v5, %v231_v6  ;;  %v233_v11 = vsel %vm2284_vm1, %v101_v7, 0  ;;  %v2054_v12 = vld [vmem:[%s2770_s3] sm:$0xff]   ;;  %1851 = vmatprep.subr.bf16.mxu0 %v2053_v9  ;;  %v102_v14 = vld [vmem:[%s2767_s0 + $0x50] sm:$0xf]  ;;  %v2055_v20 = vld [vmem:[%s2770_s3 + $0x8] sm:$0xff]  }
  0x3b   :  { %v1656_v13 = vcombine.low %v232_v8, %v233_v11  ;;  %v103_v15 = vld [vmem:[%s2767_s0 + $0x54] sm:$0xf]  ;;  %v104_v16 = vld [vmem:[%s2767_s0 + $0x58] sm:$0xf]  ;;  %v234_v17 = vsel %vm2284_vm1, %v102_v14, 0  ;;  %1869 = vmatprep.subr.bf16.mxu1 %v2054_v12  ;;  %v2058_v4 = vld [vmem:[%s2770_s3 + $0x20] sm:$0xff]  }
  0x3c   :  { %1835 = vmatprep.mubr.msk.bf16.mxu0 %vm296_vm2, %v1655_v10  ;;  %v235_v18 = vsel %vm2284_vm1, %v103_v15, 0  ;;  %v105_v19 = vld [vmem:[%s2767_s0 + $0x5c] sm:$0xf]  ;;  %v236_v22 = vsel %vm2284_vm1, %v104_v16, 0  ;;  %v106_v23 = vld [vmem:[%s2767_s0 + $0x60] sm:$0xf]  ;;  %1870 = vmatpush3.bf16.msra.mxu1 %v2054_v12 }
  0x3d   :  { %1836 = vmatmul.mubr.msk.bf16.vlgmr.msra.gmra.mrb[0].mxu0 %vm296_vm2, %v1656_v13  ;;  %v1657_v21 = vcombine.low %v234_v17, %v235_v18  ;;  %v107_v24 = vld [vmem:[%s2767_s0 + $0x64] sm:$0xf]  ;;  %v237_v25 = vsel %vm2284_vm1, %v105_v19, 0  ;;  %v108_v26 = vld [vmem:[%s2767_s0 + $0x68] sm:$0xf]  ;;  %1871 = vmatprep.subr.bf16.mxu1 %v2055_v20  ;;  %v2056_v28 = vld [vmem:[%s2770_s3 + $0x10] sm:$0xff]  }
  0x3e   :  { %1852 = vmatpush3.bf16.msra.mxu0 %v2053_v9  ;;  %v109_v27 = vld [vmem:[%s2767_s0 + $0x6c] sm:$0xf]  ;;  %v238_v29 = vsel %vm2284_vm1, %v106_v23, 0  ;;  %v239_v30 = vsel %vm2284_vm1, %v107_v24, 0  ;;  %v1658_v31 = vcombine.low %v236_v22, %v237_v25  ;;  %v240_v32 = vsel %vm2284_vm1, %v108_v26, 0  ;;  %v2057_v2 = vld [vmem:[%s2770_s3 + $0x18] sm:$0xff]  }
  0x3f   :  { %1839 = vmatprep.mubr.msk.bf16.mxu0 %vm296_vm2, %v1657_v21  ;;  %v241_v33 = vsel %vm2284_vm1, %v109_v27, 0  ;;  %v1659_v35 = vcombine.low %v238_v29, %v239_v30  ;;  %v110_v36 = vld [vmem:[%s2767_s0 + $0x70] sm:$0xf]  ;;  %v111_v37 = vld [vmem:[%s2767_s0 + $0x74] sm:$0xf]  ;;  %v2059_v26 = vld [vmem:[%s2770_s3 + $0x28] sm:$0xff]  }
  0x40   :  { %1872 = vmatpush3.bf16.msra.mxu1 %v2055_v20  ;;  %v112_v38 = vld [vmem:[%s2767_s0 + $0x78] sm:$0xf]  ;;  %v113_v39 = vld [vmem:[%s2767_s0 + $0x7c] sm:$0xf]  ;;  %v82_v40 = vld [vmem:[%s2767_s0] sm:$0xf]  ;;  %v1660_v61 = vcombine.low %v240_v32, %v241_v33 }
  0x41   :  { %1873 = vmatprep.subr.bf16.mxu1 %v2056_v28  ;;  %v83_v41 = vld [vmem:[%s2767_s0 + $0x4] sm:$0xf]  ;;  %v84_v42 = vld [vmem:[%s2767_s0 + $0x8] sm:$0xf]  ;;  %v85_v43 = vld [vmem:[%s2767_s0 + $0xc] sm:$0xf] }
  0x42   :  { %v86_v44 = vld [vmem:[%s2767_s0 + $0x10] sm:$0xf]  ;;  %v87_v45 = vld [vmem:[%s2767_s0 + $0x14] sm:$0xf]  ;;  %v88_v46 = vld [vmem:[%s2767_s0 + $0x18] sm:$0xf] }
  0x43   :  { %v89_v47 = vld [vmem:[%s2767_s0 + $0x1c] sm:$0xf]  ;;  %v242_v48 = vsel %vm2284_vm1, %v110_v36, 0  ;;  %v243_v49 = vsel %vm2284_vm1, %v111_v37, 0  ;;  %v244_v50 = vsel %vm2360_vm4, %v112_v38, 0  ;;  %v245_v51 = vsel %vm2360_vm4, %v113_v39, 0 }
  0x44   :  { %1874 = vmatpush3.bf16.msra.mxu1 %v2056_v28  ;;  %v214_v52 = vsel %vm2284_vm1, %v82_v40, 0  ;;  %v215_v53 = vsel %vm2284_vm1, %v83_v41, 0  ;;  %v216_v54 = vsel %vm2284_vm1, %v84_v42, 0  ;;  %v217_v55 = vsel %vm2284_vm1, %v85_v43, 0  ;;  %v90_v60 = vld [vmem:[%s2767_s0 + $0x20] sm:$0xf] }
  0x45   :  { %1840 = vmatmul.mubr.msk.bf16.gmra.mrb[4].mxu0 %vm296_vm2, %v1658_v31  ;;  %v218_v56 = vsel %vm2284_vm1, %v86_v44, 0  ;;  %v219_v57 = vsel %vm2284_vm1, %v87_v45, 0  ;;  %v220_v58 = vsel %vm2284_vm1, %v88_v46, 0  ;;  %v221_v59 = vsel %vm2284_vm1, %v89_v47, 0  ;;  %v91_v62 = vld [vmem:[%s2767_s0 + $0x24] sm:$0xf]  ;;  %1875 = vmatprep.subr.bf16.mxu1 %v2057_v2 }
  0x46   :  { %1843 = vmatprep.mubr.msk.bf16.mxu0 %vm296_vm2, %v1659_v35  ;;  %v1661_v63 = vcombine.low %v242_v48, %v243_v49  ;;  %v222_v1 = vsel %vm2284_vm1, %v90_v60, 0  ;;  %v223_v3 = vsel %vm2284_vm1, %v91_v62, 0  ;;  %v1662_v5 = vcombine.low %v244_v50, %v245_v51  ;;  %v92_v10 = vld [vmem:[%s2767_s0 + $0x28] sm:$0xf]  ;;  %v93_v11 = vld [vmem:[%s2767_s0 + $0x2c] sm:$0xf] }
  0x47   :  { %v1672_v6 = vcombine.low %v214_v52, %v215_v53  ;;  %v1673_v7 = vcombine.low %v216_v54, %v217_v55  ;;  %v1674_v8 = vcombine.low %v218_v56, %v219_v57  ;;  %v1675_v9 = vcombine.low %v220_v58, %v221_v59  ;;  %v94_v13 = vld [vmem:[%s2767_s0 + $0x30] sm:$0xf]  ;;  %v95_v14 = vld [vmem:[%s2767_s0 + $0x34] sm:$0xf]  ;;  %v96_v21 = vld [vmem:[%s2767_s0 + $0x38] sm:$0xf] }
  0x48   :  { %1876 = vmatpush3.bf16.msra.mxu1 %v2057_v2  ;;  %v1676_v12 = vcombine.low %v222_v1, %v223_v3  ;;  %v224_v15 = vsel %vm2284_vm1, %v92_v10, 0  ;;  %v225_v16 = vsel %vm2284_vm1, %v93_v11, 0  ;;  %v226_v17 = vsel %vm2284_vm1, %v94_v13, 0  ;;  %v97_v22 = vld [vmem:[%s2767_s0 + $0x3c] sm:$0xf]  ;;  %v2060_v27 = vld [vmem:[%s2770_s3 + $0x30] sm:$0xff]  }
  0x49   :  { %1877 = vmatprep.subr.bf16.mxu1 %v2058_v4  ;;  %v227_v18 = vsel %vm2284_vm1, %v95_v14, 0  ;;  %v1677_v19 = vcombine.low %v224_v15, %v225_v16  ;;  %v228_v23 = vsel %vm2284_vm1, %v96_v21, 0  ;;  %v229_v24 = vsel %vm2284_vm1, %v97_v22, 0  ;;  %v2061_v0 = vld [vmem:[%s2770_s3 + $0x38] sm:$0xff]   ;;  %v2062_v28 = vld [vmem:[%s2772_s5] sm:$0xff]   ;;  %v2064_v10 = vld [vmem:[%s2772_s5 + $0x10] sm:$0xff]  }
  0x4a   :  { %v1678_v20 = vcombine.low %v226_v17, %v227_v18  ;;  %v1679_v25 = vcombine.low %v228_v23, %v229_v24  ;;  %v2498_v29 = vld [vmem:[%s2769_s2] ss:$0 sm:$0xff]  ;;  %v2065_v24 = vld [vmem:[%s2772_s5 + $0x18] sm:$0xff]  }
  0x4c   :  { %1878 = vmatpush3.bf16.msra.mxu1 %v2058_v4 }
  0x4d   :  { %1844 = vmatmul.mubr.msk.bf16.gmra.mrb[8].mxu0 %vm296_vm2, %v1660_v61  ;;  %1879 = vmatprep.subr.bf16.mxu1 %v2059_v26 }
  0x4e   :  { %1847 = vmatprep.mubr.msk.bf16.mxu0 %vm296_vm2, %v1661_v63  ;;  %v2063_v63 = vld [vmem:[%s2772_s5 + $0x8] sm:$0xff]  }
  0x50   :  { %1880 = vmatpush3.bf16.msra.mxu1 %v2059_v26 }
  0x51   :  { %1881 = vmatprep.subr.bf16.mxu1 %v2060_v27 }
  0x54   :  { %1882 = vmatpush3.bf16.msra.mxu1 %v2060_v27 }
  0x55   :  { %1848 = vmatmul.mubr.msk.bf16.gmra.mrb[12].mxu0 %vm296_vm2, %v1662_v5  ;;  %1883 = vmatprep.subr.bf16.mxu1 %v2061_v0 }
  0x56   :  { %1853 = vmatprep.mubr.msk.bf16.mxu0 %vm296_vm2, %v1672_v6 }
  0x58   :  { %1884 = vmatpush3.bf16.msra.mxu1 %v2061_v0 }
  0x59   :  { %1901 = vmatprep.subr.bf16.mxu1 %v2062_v28 }
  0x5d   :  { %1854 = vmatmul.mubr.msk.bf16.vlgmr.msra.gmra.mrb[0].mxu0 %vm296_vm2, %v1673_v7 }
  0x5e   :  { %1857 = vmatprep.mubr.msk.bf16.mxu0 %vm296_vm2, %v1674_v8 }
  0x65   :  { %1858 = vmatmul.mubr.msk.bf16.gmra.mrb[4].mxu0 %vm296_vm2, %v1675_v9 }
  0x66   :  { %1861 = vmatprep.mubr.msk.bf16.mxu0 %vm296_vm2, %v1676_v12 }
  0x6d   :  { %1862 = vmatmul.mubr.msk.bf16.gmra.mrb[8].mxu0 %vm296_vm2, %v1677_v19 }
  0x6e   :  { %1865 = vmatprep.mubr.msk.bf16.mxu0 %vm296_vm2, %v1678_v20 }
  0x75   :  { %1866 = vmatmul.mubr.msk.bf16.gmra.mrb[12].mxu0 %vm296_vm2, %v1679_v25 }
 0x130   :  { %v1855_v30 = vpop.f32.mrb[0].mxu0 }
 0x131   :  { %v594_v31 = vadd.f32 %v1855_v30, %v2498_v29  ;;  %v522_v32 = vpop.f32.mrb[1].mxu0 }
 0x132   :  { %v592_v33 = vadd.f32 %v2498_v29, %v522_v32  ;;  %v1856_v34 = vpop.f32.mrb[2].mxu0 }
 0x133   :  { %v610_v35 = vmul.f32 0.2, %v594_v31  ;;  %v595_v36 = vadd.f32 %v1856_v34, %v2498_v29  ;;  %v525_v37 = vpop.f32.mrb[3].mxu0  ;;  %v2066_v34 = vld [vmem:[%s2772_s5 + $0x20] sm:$0xff]  }
 0x134   :  { %v608_v38 = vmul.f32 0.2, %v592_v33  ;;  %v593_v39 = vadd.f32 %v2498_v29, %v525_v37 }
 0x135   :  { %v611_v40 = vmul.f32 0.2, %v595_v36  ;;  %v2506_v43 = vmax.f32 %v594_v31, %v610_v35 }
 0x136   :  { %v2504_v41 = vmax.f32 %v592_v33, %v608_v38  ;;  %v609_v42 = vmul.f32 0.2, %v593_v39 }
 0x137   :  { %v2508_v44 = vmax.f32 %v595_v36, %v611_v40  ;;  %v642_v54 = vmax.f32 %v2506_v43, 0.0 }
 0x138   :  { %v2510_v45 = vmax.f32 %v593_v39, %v609_v42  ;;  %v1859_v46 = vpop.f32.mrb[4].mxu0  ;;  %v640_v52 = vmax.f32 %v2504_v41, 0.0 }
 0x139   :  { %v643_v47 = vmax.f32 %v2508_v44, 0.0  ;;  %v598_v48 = vadd.f32 %v1859_v46, %v2498_v29  ;;  %v538_v49 = vpop.f32.mrb[5].mxu0 }
 0x13a   :  { %v596_v50 = vadd.f32 %v2498_v29, %v538_v49  ;;  %v1860_v51 = vpop.f32.mrb[6].mxu0  ;;  %v641_v53 = vmax.f32 %v2510_v45, 0.0 }
 0x13b   :  { %v614_v55 = vmul.f32 0.2, %v598_v48  ;;  %v599_v56 = vadd.f32 %v1860_v51, %v2498_v29  ;;  %v541_v57 = vpop.f32.mrb[7].mxu0  ;;  %v657_v62 = vpack.c.bf16 %v643_v47, %v642_v54 }
 0x13c   :  { %v612_v58 = vmul.f32 0.2, %v596_v50  ;;  %v597_v59 = vadd.f32 %v2498_v29, %v541_v57  ;;  %v656_v60 = vpack.c.bf16 %v641_v53, %v640_v52  ;;  %v2067_v52 = vld [vmem:[%s2772_s5 + $0x28] sm:$0xff]  }
 0x13d   :  { %v615_v61 = vmul.f32 0.2, %v599_v56  ;;  %v2525_v3 = vmax.f32 %v598_v48, %v614_v55 }
 0x13e   :  { %v2523_v1 = vmax.f32 %v596_v50, %v612_v58  ;;  %v613_v2 = vmul.f32 0.2, %v597_v59  ;;  %1885 = vmatprep.mubr.bf16.mxu1 %v656_v60 }
 0x13f   :  { %v2527_v4 = vmax.f32 %v599_v56, %v615_v61  ;;  %1886 = vmatmul.mubr.bf16.vlgmr.msra.gmra.mrb[0].mxu1 %v657_v62  ;;  %v646_v15 = vmax.f32 %v2525_v3, 0.0 }
 0x140   :  { %v2529_v5 = vmax.f32 %v597_v59, %v613_v2  ;;  %v1863_v6 = vpop.f32.mrb[8].mxu0  ;;  %1902 = vmatpush3.bf16.msra.mxu1 %v2062_v28  ;;  %v644_v11 = vmax.f32 %v2523_v1, 0.0  ;;  %v2069_v2 = vld [vmem:[%s2772_s5 + $0x38] sm:$0xff]  }
 0x141   :  { %v647_v7 = vmax.f32 %v2527_v4, 0.0  ;;  %v602_v8 = vadd.f32 %v1863_v6, %v2498_v29  ;;  %v554_v9 = vpop.f32.mrb[9].mxu0  ;;  %1903 = vmatprep.subr.bf16.mxu1 %v2063_v63  ;;  %v2070_v6 = vld [vmem:[%s2774_s7] sm:$0xff]  }
 0x142   :  { %v645_v12 = vmax.f32 %v2529_v5, 0.0  ;;  %v600_v13 = vadd.f32 %v2498_v29, %v554_v9  ;;  %v1864_v14 = vpop.f32.mrb[10].mxu0  ;;  %1933 = vmatprep.subr.bf16.mxu0 %v2070_v6  ;;  %v2073_v9 = vld [vmem:[%s2774_s7 + $0x18] sm:$0xff]  }
 0x143   :  { %v618_v16 = vmul.f32 0.2, %v602_v8  ;;  %v603_v17 = vadd.f32 %v1864_v14, %v2498_v29  ;;  %v557_v18 = vpop.f32.mrb[11].mxu0  ;;  %v659_v23 = vpack.c.bf16 %v647_v7, %v646_v15  ;;  %v2071_v7 = vld [vmem:[%s2774_s7 + $0x8] sm:$0xff]   ;;  %1934 = vmatpush3.bf16.msra.mxu0 %v2070_v6 }
 0x144   :  { %v616_v19 = vmul.f32 0.2, %v600_v13  ;;  %v601_v20 = vadd.f32 %v2498_v29, %v557_v18  ;;  %v658_v21 = vpack.c.bf16 %v645_v12, %v644_v11  ;;  %1904 = vmatpush3.bf16.msra.mxu1 %v2063_v63  ;;  %v2068_v63 = vld [vmem:[%s2772_s5 + $0x30] sm:$0xff]   ;;  %1935 = vmatprep.subr.bf16.mxu0 %v2071_v7  ;;  %v1690_v11 = vld [vmem:[%s2771_s4] ss:$0 sm:$0xff] }
 0x145   :  { %v619_v22 = vmul.f32 0.2, %v603_v17  ;;  %1905 = vmatprep.subr.bf16.mxu1 %v2064_v10  ;;  %v2547_v27 = vmax.f32 %v602_v8, %v618_v16  ;;  %v2072_v8 = vld [vmem:[%s2774_s7 + $0x10] sm:$0xff]  }
 0x146   :  { %v2545_v25 = vmax.f32 %v600_v13, %v616_v19  ;;  %v617_v26 = vmul.f32 0.2, %v601_v20  ;;  %1889 = vmatprep.mubr.bf16.mxu1 %v658_v21 }
 0x147   :  { %v2549_v0 = vmax.f32 %v603_v17, %v619_v22  ;;  %1890 = vmatmul.mubr.bf16.gmra.mrb[4].mxu1 %v659_v23  ;;  %v650_v39 = vmax.f32 %v2547_v27, 0.0  ;;  %1936 = vmatpush3.bf16.msra.mxu0 %v2071_v7 }
 0x148   :  { %v2551_v28 = vmax.f32 %v601_v20, %v617_v26  ;;  %v1867_v30 = vpop.f32.mrb[12].mxu0  ;;  %1906 = vmatpush3.bf16.msra.mxu1 %v2064_v10  ;;  %v648_v35 = vmax.f32 %v2545_v25, 0.0  ;;  %1937 = vmatprep.subr.bf16.mxu0 %v2072_v8  ;;  %v2074_v10 = vld [vmem:[%s2774_s7 + $0x20] sm:$0xff]  }
 0x149   :  { %v651_v31 = vmax.f32 %v2549_v0, 0.0  ;;  %v606_v32 = vadd.f32 %v1867_v30, %v2498_v29  ;;  %v570_v33 = vpop.f32.mrb[13].mxu0  ;;  %1907 = vmatprep.subr.bf16.mxu1 %v2065_v24 }
 0x14a   :  { %v649_v36 = vmax.f32 %v2551_v28, 0.0  ;;  %v604_v37 = vadd.f32 %v2498_v29, %v570_v33  ;;  %v1868_v38 = vpop.f32.mrb[14].mxu0 }
 0x14b   :  { %v622_v40 = vmul.f32 0.2, %v606_v32  ;;  %v607_v42 = vadd.f32 %v1868_v38, %v2498_v29  ;;  %v573_v46 = vpop.f32.mrb[15].mxu0  ;;  %v661_v51 = vpack.c.bf16 %v651_v31, %v650_v39  ;;  %1938 = vmatpush3.bf16.msra.mxu0 %v2072_v8 }
 0x14c   :  { %v620_v47 = vmul.f32 0.2, %v604_v37  ;;  %v605_v48 = vadd.f32 %v2498_v29, %v573_v46  ;;  %v660_v49 = vpack.c.bf16 %v649_v36, %v648_v35  ;;  %1908 = vmatpush3.bf16.msra.mxu1 %v2065_v24  ;;  %1939 = vmatprep.subr.bf16.mxu0 %v2073_v9 }
 0x14d   :  { %v623_v50 = vmul.f32 0.2, %v607_v42  ;;  %1909 = vmatprep.subr.bf16.mxu1 %v2066_v34  ;;  %v2569_v55 = vmax.f32 %v606_v32, %v622_v40 }
 0x14e   :  { %v2567_v53 = vmax.f32 %v604_v37, %v620_v47  ;;  %v621_v54 = vmul.f32 0.2, %v605_v48  ;;  %1893 = vmatprep.mubr.bf16.mxu1 %v660_v49 }
 0x14f   :  { %v2571_v56 = vmax.f32 %v607_v42, %v623_v50  ;;  %1894 = vmatmul.mubr.bf16.gmra.mrb[8].mxu1 %v661_v51  ;;  %v654_v60 = vmax.f32 %v2569_v55, 0.0  ;;  %1940 = vmatpush3.bf16.msra.mxu0 %v2073_v9 }
 0x150   :  { %v2573_v57 = vmax.f32 %v605_v48, %v621_v54  ;;  %1910 = vmatpush3.bf16.msra.mxu1 %v2066_v34  ;;  %v652_v58 = vmax.f32 %v2567_v53, 0.0  ;;  %1941 = vmatprep.subr.bf16.mxu0 %v2074_v10 }
 0x151   :  { %v655_v29 = vmax.f32 %v2571_v56, 0.0  ;;  %1911 = vmatprep.subr.bf16.mxu1 %v2067_v52 }
 0x152   :  { %v653_v59 = vmax.f32 %v2573_v57, 0.0 }
 0x153   :  { %v663_v62 = vpack.c.bf16 %v655_v29, %v654_v60  ;;  %1942 = vmatpush3.bf16.msra.mxu0 %v2074_v10 }
 0x154   :  { %v662_v61 = vpack.c.bf16 %v653_v59, %v652_v58  ;;  %1912 = vmatpush3.bf16.msra.mxu1 %v2067_v52 }
 0x155   :  { %1913 = vmatprep.subr.bf16.mxu1 %v2068_v63 }
 0x156   :  { %1897 = vmatprep.mubr.bf16.mxu1 %v662_v61 }
 0x157   :  { %1898 = vmatmul.mubr.bf16.gmra.mrb[12].mxu1 %v663_v62 }
 0x158   :  { %1914 = vmatpush3.bf16.msra.mxu1 %v2068_v63 }
 0x159   :  { %1915 = vmatprep.subr.bf16.mxu1 %v2069_v2 }
 0x15c   :  { %1916 = vmatpush3.bf16.msra.mxu1 %v2069_v2 }
 0x212   :  { %v1887_v12 = vpop.f32.mrb[0].mxu1 }
 0x213   :  { %v778_v13 = vadd.f32 %v1887_v12, %v1690_v11  ;;  %v769_v14 = vpop.f32.mrb[1].mxu1 }
 0x214   :  { %v770_v15 = vadd.f32 %v1690_v11, %v769_v14  ;;  %v1888_v16 = vpop.f32.mrb[2].mxu1 }
 0x215   :  { %v781_v17 = vadd.f32 %v1888_v16, %v1690_v11  ;;  %v772_v18 = vpop.f32.mrb[3].mxu1  ;;  %v834_v20 = vmax.f32 %v778_v13, 0.0 }
 0x216   :  { %v773_v19 = vadd.f32 %v1690_v11, %v772_v18  ;;  %v832_v22 = vmax.f32 %v770_v15, 0.0 }
 0x217   :  { %v835_v21 = vmax.f32 %v781_v17, 0.0 }
 0x218   :  { %v833_v23 = vmax.f32 %v773_v19, 0.0 }
 0x219   :  { %v849_v24 = vpack.c.bf16 %v835_v21, %v834_v20  ;;  %v2075_v21 = vld [vmem:[%s2774_s7 + $0x28] sm:$0xff]  }
 0x21a   :  { %v848_v26 = vpack.c.bf16 %v833_v23, %v832_v22  ;;  %v1891_v30 = vpop.f32.mrb[4].mxu1  ;;  %1943 = vmatprep.subr.bf16.mxu0 %v2075_v21  ;;  %v2076_v22 = vld [vmem:[%s2774_s7 + $0x30] sm:$0xff]   ;;  %v2078_v23 = vld [vmem:[%s2776_s9] sm:$0xff]  }
 0x21b   :  { %v794_v31 = vadd.f32 %v1891_v30, %v1690_v11  ;;  %v785_v32 = vpop.f32.mrb[5].mxu1  ;;  %1944 = vmatpush3.bf16.msra.mxu0 %v2075_v21  ;;  %1965 = vmatprep.subr.bf16.mxu1 %v2078_v23  ;;  %v2081_v30 = vld [vmem:[%s2776_s9 + $0x18] sm:$0xff]  }
 0x21c   :  { %v786_v33 = vadd.f32 %v1690_v11, %v785_v32  ;;  %v1892_v34 = vpop.f32.mrb[6].mxu1  ;;  %1917 = vmatprep.mubr.bf16.mxu1 %v848_v26  ;;  %1945 = vmatprep.subr.bf16.mxu0 %v2076_v22  ;;  %v2080_v26 = vld [vmem:[%s2776_s9 + $0x10] sm:$0xff]   ;;  %v2083_v32 = vld [vmem:[%s2776_s9 + $0x28] sm:$0xff]  }
 0x21d   :  { %v797_v35 = vadd.f32 %v1892_v34, %v1690_v11  ;;  %v788_v36 = vpop.f32.mrb[7].mxu1  ;;  %1918 = vmatmul.mubr.bf16.vlgmr.msra.gmra.mrb[16].mxu1 %v849_v24  ;;  %v838_v38 = vmax.f32 %v794_v31, 0.0  ;;  %v2079_v24 = vld [vmem:[%s2776_s9 + $0x8] sm:$0xff]   ;;  %v2082_v31 = vld [vmem:[%s2776_s9 + $0x20] sm:$0xff]  }
 0x21e   :  { %v789_v37 = vadd.f32 %v1690_v11, %v788_v36  ;;  %v836_v40 = vmax.f32 %v786_v33, 0.0  ;;  %1966 = vmatpush3.bf16.msra.mxu1 %v2078_v23  ;;  %v2633_v33 = vld [vmem:[%s2773_s6] ss:$0 sm:$0xff] }
 0x21f   :  { %v839_v39 = vmax.f32 %v797_v35, 0.0  ;;  %1946 = vmatpush3.bf16.msra.mxu0 %v2076_v22  ;;  %1967 = vmatprep.subr.bf16.mxu1 %v2079_v24 }
 0x220   :  { %v837_v42 = vmax.f32 %v789_v37, 0.0 }
 0x221   :  { %v851_v46 = vpack.c.bf16 %v839_v39, %v838_v38 }
 0x222   :  { %v850_v47 = vpack.c.bf16 %v837_v42, %v836_v40  ;;  %v1895_v48 = vpop.f32.mrb[8].mxu1  ;;  %1968 = vmatpush3.bf16.msra.mxu1 %v2079_v24 }
 0x223   :  { %v810_v49 = vadd.f32 %v1895_v48, %v1690_v11  ;;  %v801_v50 = vpop.f32.mrb[9].mxu1  ;;  %1969 = vmatprep.subr.bf16.mxu1 %v2080_v26 }
 0x224   :  { %v802_v51 = vadd.f32 %v1690_v11, %v801_v50  ;;  %v1896_v52 = vpop.f32.mrb[10].mxu1  ;;  %1921 = vmatprep.mubr.bf16.mxu1 %v850_v47 }
 0x225   :  { %v813_v54 = vadd.f32 %v1896_v52, %v1690_v11  ;;  %v804_v29 = vpop.f32.mrb[11].mxu1  ;;  %1922 = vmatmul.mubr.bf16.gmra.mrb[20].mxu1 %v851_v46  ;;  %v842_v59 = vmax.f32 %v810_v49, 0.0 }
 0x226   :  { %v805_v58 = vadd.f32 %v1690_v11, %v804_v29  ;;  %v840_v61 = vmax.f32 %v802_v51, 0.0  ;;  %1970 = vmatpush3.bf16.msra.mxu1 %v2080_v26 }
 0x227   :  { %v843_v60 = vmax.f32 %v813_v54, 0.0  ;;  %1971 = vmatprep.subr.bf16.mxu1 %v2081_v30 }
 0x228   :  { %v841_v62 = vmax.f32 %v805_v58, 0.0 }
 0x229   :  { %v853_v63 = vpack.c.bf16 %v843_v60, %v842_v59 }
 0x22a   :  { %v852_v2 = vpack.c.bf16 %v841_v62, %v840_v61  ;;  %v1899_v6 = vpop.f32.mrb[12].mxu1  ;;  %1972 = vmatpush3.bf16.msra.mxu1 %v2081_v30 }
 0x22b   :  { %v826_v7 = vadd.f32 %v1899_v6, %v1690_v11  ;;  %v817_v8 = vpop.f32.mrb[13].mxu1  ;;  %1973 = vmatprep.subr.bf16.mxu1 %v2082_v31 }
 0x22c   :  { %v818_v9 = vadd.f32 %v1690_v11, %v817_v8  ;;  %v1900_v10 = vpop.f32.mrb[14].mxu1  ;;  %1925 = vmatprep.mubr.bf16.mxu1 %v852_v2 }
 0x22d   :  { %v829_v12 = vadd.f32 %v1900_v10, %v1690_v11  ;;  %v820_v13 = vpop.f32.mrb[15].mxu1  ;;  %1926 = vmatmul.mubr.bf16.gmra.mrb[24].mxu1 %v853_v63  ;;  %v846_v15 = vmax.f32 %v826_v7, 0.0 }
 0x22e   :  { %v821_v14 = vadd.f32 %v1690_v11, %v820_v13  ;;  %v844_v17 = vmax.f32 %v818_v9, 0.0  ;;  %v2077_v11 = vld [vmem:[%s2774_s7 + $0x38] sm:$0xff]   ;;  %1974 = vmatpush3.bf16.msra.mxu1 %v2082_v31 }
 0x22f   :  { %v847_v16 = vmax.f32 %v829_v12, 0.0  ;;  %1947 = vmatprep.subr.bf16.mxu0 %v2077_v11  ;;  %1975 = vmatprep.subr.bf16.mxu1 %v2083_v32 }
 0x230   :  { %v845_v18 = vmax.f32 %v821_v14, 0.0  ;;  %1948 = vmatpush3.bf16.msra.mxu0 %v2077_v11 }
 0x231   :  { %v855_v19 = vpack.c.bf16 %v847_v16, %v846_v15 }
 0x232   :  { %v854_v20 = vpack.c.bf16 %v845_v18, %v844_v17  ;;  %1976 = vmatpush3.bf16.msra.mxu1 %v2083_v32 }
 0x234   :  { %1929 = vmatprep.mubr.bf16.mxu1 %v854_v20 }
 0x235   :  { %1930 = vmatmul.mubr.bf16.gmra.mrb[28].mxu1 %v855_v19 }
 0x2f0   :  { %v1919_v34 = vpop.f32.mrb[16].mxu1 }
 0x2f1   :  { %v970_v35 = vadd.f32 %v1919_v34, %v2633_v33  ;;  %v961_v36 = vpop.f32.mrb[17].mxu1 }
 0x2f2   :  { %v962_v37 = vadd.f32 %v2633_v33, %v961_v36  ;;  %v1920_v38 = vpop.f32.mrb[18].mxu1 }
 0x2f3   :  { %v973_v39 = vadd.f32 %v1920_v38, %v2633_v33  ;;  %v964_v40 = vpop.f32.mrb[19].mxu1  ;;  %v2643_v47 = vadd.f32 %v970_v35, %v2506_v43 }
 0x2f4   :  { %v2639_v42 = vadd.f32 %v962_v37, %v2504_v41  ;;  %v965_v46 = vadd.f32 %v2633_v33, %v964_v40 }
 0x2f5   :  { %v2646_v48 = vadd.f32 %v973_v39, %v2508_v44  ;;  %v1042_v41 = vmax.f32 %v2643_v47, 0.0 }
 0x2f6   :  { %v2649_v49 = vadd.f32 %v965_v46, %v2510_v45  ;;  %v1040_v51 = vmax.f32 %v2639_v42, 0.0 }
 0x2f7   :  { %v1043_v50 = vmax.f32 %v2646_v48, 0.0 }
 0x2f8   :  { %v1041_v52 = vmax.f32 %v2649_v49, 0.0  ;;  %v1923_v54 = vpop.f32.mrb[20].mxu1 }
 0x2f9   :  { %v986_v29 = vadd.f32 %v1923_v54, %v2633_v33  ;;  %v977_v58 = vpop.f32.mrb[21].mxu1  ;;  %v1057_v60 = vpack.c.bf16 %v1043_v50, %v1042_v41  ;;  %v2087_v54 = vld [vmem:[%s2778_s11 + $0x8] sm:$0xff]   ;;  %v2088_v41 = vld [vmem:[%s2778_s11 + $0x10] sm:$0xff]  }
 0x2fa   :  { %v978_v43 = vadd.f32 %v2633_v33, %v977_v58  ;;  %v1924_v59 = vpop.f32.mrb[22].mxu1  ;;  %v1056_v44 = vpack.c.bf16 %v1041_v52, %v1040_v51  ;;  %v2090_v58 = vld [vmem:[%s2778_s11 + $0x20] sm:$0xff]  }
 0x2fb   :  { %v989_v45 = vadd.f32 %v1924_v59, %v2633_v33  ;;  %v980_v61 = vpop.f32.mrb[23].mxu1  ;;  %v2663_v2 = vadd.f32 %v986_v29, %v2525_v3  ;;  %v2089_v29 = vld [vmem:[%s2778_s11 + $0x18] sm:$0xff]   ;;  %v1708_v59 = vld [vmem:[#allocation4] ss:$0 sm:$0xff] }
 0x2fc   :  { %v2659_v62 = vadd.f32 %v978_v43, %v2523_v1  ;;  %v981_v63 = vadd.f32 %v2633_v33, %v980_v61  ;;  %1949 = vmatprep.mubr.bf16.mxu0 %v1056_v44  ;;  %v2091_v43 = vld [vmem:[%s2778_s11 + $0x28] sm:$0xff]  }
 0x2fd   :  { %v2666_v6 = vadd.f32 %v989_v45, %v2527_v4  ;;  %1950 = vmatmul.mubr.bf16.vlgmr.msra.gmra.mrb[16].mxu0 %v1057_v60  ;;  %v1046_v12 = vmax.f32 %v2663_v2, 0.0 }
 0x2fe   :  { %v2669_v7 = vadd.f32 %v981_v63, %v2529_v5  ;;  %v1044_v9 = vmax.f32 %v2659_v62, 0.0 }
 0x2ff   :  { %v1047_v8 = vmax.f32 %v2666_v6, 0.0 }
 0x300   :  { %v1045_v1 = vmax.f32 %v2669_v7, 0.0  ;;  %v1927_v10 = vpop.f32.mrb[24].mxu1 }
 0x301   :  { %v1002_v13 = vadd.f32 %v1927_v10, %v2633_v33  ;;  %v993_v3 = vpop.f32.mrb[25].mxu1  ;;  %v1059_v17 = vpack.c.bf16 %v1047_v8, %v1046_v12 }
 0x302   :  { %v994_v14 = vadd.f32 %v2633_v33, %v993_v3  ;;  %v1928_v4 = vpop.f32.mrb[26].mxu1  ;;  %v1058_v15 = vpack.c.bf16 %v1045_v1, %v1044_v9 }
 0x303   :  { %v1005_v16 = vadd.f32 %v1928_v4, %v2633_v33  ;;  %v996_v5 = vpop.f32.mrb[27].mxu1  ;;  %v2683_v20 = vadd.f32 %v1002_v13, %v2547_v27 }
 0x304   :  { %v2679_v18 = vadd.f32 %v994_v14, %v2545_v25  ;;  %v997_v19 = vadd.f32 %v2633_v33, %v996_v5  ;;  %1953 = vmatprep.mubr.bf16.mxu0 %v1058_v15 }
 0x305   :  { %v2686_v21 = vadd.f32 %v1005_v16, %v2549_v0  ;;  %1954 = vmatmul.mubr.bf16.gmra.mrb[20].mxu0 %v1059_v17  ;;  %v1050_v26 = vmax.f32 %v2683_v20, 0.0 }
 0x306   :  { %v2689_v22 = vadd.f32 %v997_v19, %v2551_v28  ;;  %v1048_v23 = vmax.f32 %v2679_v18, 0.0 }
 0x307   :  { %v1051_v11 = vmax.f32 %v2686_v21, 0.0 }
 0x308   :  { %v1049_v25 = vmax.f32 %v2689_v22, 0.0  ;;  %v1931_v24 = vpop.f32.mrb[28].mxu1 }
 0x309   :  { %v1018_v30 = vadd.f32 %v1931_v24, %v2633_v33  ;;  %v1009_v27 = vpop.f32.mrb[29].mxu1  ;;  %v1061_v35 = vpack.c.bf16 %v1051_v11, %v1050_v26 }
 0x30a   :  { %v1010_v31 = vadd.f32 %v2633_v33, %v1009_v27  ;;  %v1932_v0 = vpop.f32.mrb[30].mxu1  ;;  %v1060_v32 = vpack.c.bf16 %v1049_v25, %v1048_v23 }
 0x30b   :  { %v1021_v34 = vadd.f32 %v1932_v0, %v2633_v33  ;;  %v1012_v28 = vpop.f32.mrb[31].mxu1  ;;  %v2703_v38 = vadd.f32 %v1018_v30, %v2569_v55  ;;  %v2084_v55 = vld [vmem:[%s2776_s9 + $0x30] sm:$0xff]  }
 0x30c   :  { %v2699_v36 = vadd.f32 %v1010_v31, %v2567_v53  ;;  %v1013_v37 = vadd.f32 %v2633_v33, %v1012_v28  ;;  %1957 = vmatprep.mubr.bf16.mxu0 %v1060_v32  ;;  %1977 = vmatprep.subr.bf16.mxu1 %v2084_v55 }
 0x30d   :  { %v2706_v39 = vadd.f32 %v1021_v34, %v2571_v56  ;;  %1958 = vmatmul.mubr.bf16.gmra.mrb[24].mxu0 %v1061_v35  ;;  %v1054_v51 = vmax.f32 %v2703_v38, 0.0  ;;  %1978 = vmatpush3.bf16.msra.mxu1 %v2084_v55  ;;  %v2085_v56 = vld [vmem:[%s2776_s9 + $0x38] sm:$0xff]  }
 0x30e   :  { %v2709_v40 = vadd.f32 %v1013_v37, %v2573_v57  ;;  %v1052_v50 = vmax.f32 %v2699_v36, 0.0  ;;  %1979 = vmatprep.subr.bf16.mxu1 %v2085_v56  ;;  %v2086_v57 = vld [vmem:[%s2778_s11] sm:$0xff]  }
 0x30f   :  { %v1055_v46 = vmax.f32 %v2706_v39, 0.0  ;;  %1997 = vmatprep.subr.bf16.mxu0 %v2086_v57 }
 0x310   :  { %v1053_v53 = vmax.f32 %v2709_v40, 0.0  ;;  %1998 = vmatpush3.bf16.msra.mxu0 %v2086_v57 }
 0x311   :  { %v1063_v52 = vpack.c.bf16 %v1055_v46, %v1054_v51  ;;  %1980 = vmatpush3.bf16.msra.mxu1 %v2085_v56  ;;  %1999 = vmatprep.subr.bf16.mxu0 %v2087_v54 }
 0x312   :  { %v1062_v33 = vpack.c.bf16 %v1053_v53, %v1052_v50 }
 0x314   :  { %1961 = vmatprep.mubr.bf16.mxu0 %v1062_v33  ;;  %2000 = vmatpush3.bf16.msra.mxu0 %v2087_v54 }
 0x315   :  { %1962 = vmatmul.mubr.bf16.gmra.mrb[28].mxu0 %v1063_v52  ;;  %2001 = vmatprep.subr.bf16.mxu0 %v2088_v41 }
 0x318   :  { %2002 = vmatpush3.bf16.msra.mxu0 %v2088_v41 }
 0x319   :  { %2003 = vmatprep.subr.bf16.mxu0 %v2089_v29 }
 0x31c   :  { %2004 = vmatpush3.bf16.msra.mxu0 %v2089_v29 }
 0x31d   :  { %2005 = vmatprep.subr.bf16.mxu0 %v2090_v58 }
 0x320   :  { %2006 = vmatpush3.bf16.msra.mxu0 %v2090_v58 }
 0x321   :  { %2007 = vmatprep.subr.bf16.mxu0 %v2091_v43 }
 0x324   :  { %2008 = vmatpush3.bf16.msra.mxu0 %v2091_v43 }
 0x3d0   :  { %v1951_v44 = vpop.f32.mrb[16].mxu0 }
 0x3d1   :  { %v1178_v60 = vadd.f32 %v1951_v44, %v1708_v59  ;;  %v1169_v45 = vpop.f32.mrb[17].mxu0 }
 0x3d2   :  { %v1170_v61 = vadd.f32 %v1708_v59, %v1169_v45  ;;  %v1952_v63 = vpop.f32.mrb[18].mxu0 }
 0x3d3   :  { %v1181_v8 = vadd.f32 %v1952_v63, %v1708_v59  ;;  %v1172_v9 = vpop.f32.mrb[19].mxu0  ;;  %v1234_v10 = vmax.f32 %v1178_v60, 0.0 }
 0x3d4   :  { %v1173_v1 = vadd.f32 %v1708_v59, %v1172_v9  ;;  %v1232_v13 = vmax.f32 %v1170_v61, 0.0 }
 0x3d5   :  { %v1235_v12 = vmax.f32 %v1181_v8, 0.0 }
 0x3d6   :  { %v1233_v3 = vmax.f32 %v1173_v1, 0.0 }
 0x3d7   :  { %v1249_v14 = vpack.c.bf16 %v1235_v12, %v1234_v10  ;;  %v2092_v12 = vld [vmem:[%s2778_s11 + $0x30] sm:$0xff]  }
 0x3d8   :  { %v1248_v4 = vpack.c.bf16 %v1233_v3, %v1232_v13  ;;  %v1955_v15 = vpop.f32.mrb[20].mxu0  ;;  %2009 = vmatprep.subr.bf16.mxu0 %v2092_v12  ;;  %v2093_v13 = vld [vmem:[%s2778_s11 + $0x38] sm:$0xff]  }
 0x3d9   :  { %v1194_v16 = vadd.f32 %v1955_v15, %v1708_v59  ;;  %v1185_v5 = vpop.f32.mrb[21].mxu0  ;;  %2010 = vmatpush3.bf16.msra.mxu0 %v2092_v12 }
 0x3da   :  { %v1186_v17 = vadd.f32 %v1708_v59, %v1185_v5  ;;  %v1956_v19 = vpop.f32.mrb[22].mxu0  ;;  %1981 = vmatprep.mubr.bf16.mxu1 %v1248_v4  ;;  %2011 = vmatprep.subr.bf16.mxu0 %v2093_v13 }
 0x3db   :  { %v1197_v11 = vadd.f32 %v1956_v19, %v1708_v59  ;;  %v1188_v23 = vpop.f32.mrb[23].mxu0  ;;  %1982 = vmatmul.mubr.bf16.vlgmr.msra.gmra.mrb[32].mxu1 %v1249_v14  ;;  %v1238_v24 = vmax.f32 %v1194_v16, 0.0 }
 0x3dc   :  { %v1189_v25 = vadd.f32 %v1708_v59, %v1188_v23  ;;  %v1236_v30 = vmax.f32 %v1186_v17, 0.0 }
 0x3dd   :  { %v1239_v26 = vmax.f32 %v1197_v11, 0.0  ;;  %2012 = vmatpush3.bf16.msra.mxu0 %v2093_v13 }
 0x3de   :  { %v1237_v27 = vmax.f32 %v1189_v25, 0.0 }
 0x3df   :  { %v1251_v31 = vpack.c.bf16 %v1239_v26, %v1238_v24 }
 0x3e0   :  { %v1250_v0 = vpack.c.bf16 %v1237_v27, %v1236_v30  ;;  %v1959_v32 = vpop.f32.mrb[24].mxu0 }
 0x3e1   :  { %v1210_v34 = vadd.f32 %v1959_v32, %v1708_v59  ;;  %v1201_v28 = vpop.f32.mrb[25].mxu0 }
 0x3e2   :  { %v1202_v35 = vadd.f32 %v1708_v59, %v1201_v28  ;;  %v1960_v37 = vpop.f32.mrb[26].mxu0  ;;  %1985 = vmatprep.mubr.bf16.mxu1 %v1250_v0 }
 0x3e3   :  { %v1213_v46 = vadd.f32 %v1960_v37, %v1708_v59  ;;  %v1204_v50 = vpop.f32.mrb[27].mxu0  ;;  %1986 = vmatmul.mubr.bf16.gmra.mrb[36].mxu1 %v1251_v31  ;;  %v1242_v51 = vmax.f32 %v1210_v34, 0.0 }
 0x3e4   :  { %v1205_v53 = vadd.f32 %v1708_v59, %v1204_v50  ;;  %v1240_v52 = vmax.f32 %v1202_v35, 0.0 }
 0x3e5   :  { %v1243_v33 = vmax.f32 %v1213_v46, 0.0 }
 0x3e6   :  { %v1241_v55 = vmax.f32 %v1205_v53, 0.0 }
 0x3e7   :  { %v1253_v56 = vpack.c.bf16 %v1243_v33, %v1242_v51 }
 0x3e8   :  { %v1252_v57 = vpack.c.bf16 %v1241_v55, %v1240_v52  ;;  %v1963_v54 = vpop.f32.mrb[28].mxu0 }
 0x3e9   :  { %v1226_v41 = vadd.f32 %v1963_v54, %v1708_v59  ;;  %v1217_v29 = vpop.f32.mrb[29].mxu0 }
 0x3ea   :  { %v1218_v58 = vadd.f32 %v1708_v59, %v1217_v29  ;;  %v1964_v43 = vpop.f32.mrb[30].mxu0  ;;  %1989 = vmatprep.mubr.bf16.mxu1 %v1252_v57 }
 0x3eb   :  { %v1229_v44 = vadd.f32 %v1964_v43, %v1708_v59  ;;  %v1220_v60 = vpop.f32.mrb[31].mxu0  ;;  %1990 = vmatmul.mubr.bf16.gmra.mrb[40].mxu1 %v1253_v56  ;;  %v1246_v61 = vmax.f32 %v1226_v41, 0.0 }
 0x3ec   :  { %v1221_v45 = vadd.f32 %v1708_v59, %v1220_v60  ;;  %v1244_v8 = vmax.f32 %v1218_v58, 0.0  ;;  %v1717_v59 = vld [vmem:[#allocation6] ss:$0 sm:$0xff] }
 0x3ed   :  { %v1247_v63 = vmax.f32 %v1229_v44, 0.0 }
 0x3ee   :  { %v1245_v9 = vmax.f32 %v1221_v45, 0.0 }
 0x3ef   :  { %v1255_v1 = vpack.c.bf16 %v1247_v63, %v1246_v61 }
 0x3f0   :  { %v1254_v10 = vpack.c.bf16 %v1245_v9, %v1244_v8 }
 0x3f2   :  { %1993 = vmatprep.mubr.bf16.mxu1 %v1254_v10  ;;  %v1726_v10 = vld [vmem:[%s2779_s12] ss:$0 sm:$0xff] }
 0x3f3   :  { %1994 = vmatmul.mubr.bf16.gmra.mrb[44].mxu1 %v1255_v1 }
 0x4ae   :  { %v1983_v3 = vpop.f32.mrb[32].mxu1 }
 0x4af   :  { %v1370_v14 = vadd.f32 %v1983_v3, %v1717_v59  ;;  %v1361_v4 = vpop.f32.mrb[33].mxu1 }
 0x4b0   :  { %v1362_v15 = vadd.f32 %v1717_v59, %v1361_v4  ;;  %v1984_v16 = vpop.f32.mrb[34].mxu1 }
 0x4b1   :  { %v1373_v5 = vadd.f32 %v1984_v16, %v1717_v59  ;;  %v1364_v17 = vpop.f32.mrb[35].mxu1  ;;  %v1426_v11 = vadd.f32 %v1370_v14, %v2643_v47 }
 0x4b2   :  { %v1365_v19 = vadd.f32 %v1717_v59, %v1364_v17  ;;  %v1424_v25 = vadd.f32 %v1362_v15, %v2639_v42 }
 0x4b3   :  { %v1427_v23 = vadd.f32 %v1373_v5, %v2646_v48 }
 0x4b4   :  { %v1425_v24 = vadd.f32 %v1365_v19, %v2649_v49 }
 0x4b5   :  { %v1441_v26 = vpack.c.bf16 %v1427_v23, %v1426_v11 }
 0x4b6   :  { %v1987_v30 = vpop.f32.mrb[36].mxu1  ;;  %v1440_v27 = vpack.c.bf16 %v1425_v24, %v1424_v25 }
 0x4b7   :  { %v1386_v31 = vadd.f32 %v1987_v30, %v1717_v59  ;;  %v1377_v0 = vpop.f32.mrb[37].mxu1 }
 0x4b8   :  { %v1378_v32 = vadd.f32 %v1717_v59, %v1377_v0  ;;  %v1988_v34 = vpop.f32.mrb[38].mxu1  ;;  %2013 = vmatprep.mubr.bf16.mxu0 %v1440_v27 }
 0x4b9   :  { %v1389_v28 = vadd.f32 %v1988_v34, %v1717_v59  ;;  %v1380_v35 = vpop.f32.mrb[39].mxu1  ;;  %2014 = vmatmul.mubr.bf16.vlgmr.msra.gmra.mrb[32].mxu0 %v1441_v26  ;;  %v1430_v47 = vadd.f32 %v1386_v31, %v2663_v2 }
 0x4ba   :  { %v1381_v37 = vadd.f32 %v1717_v59, %v1380_v35  ;;  %v1428_v42 = vadd.f32 %v1378_v32, %v2659_v62 }
 0x4bb   :  { %v1431_v48 = vadd.f32 %v1389_v28, %v2666_v6 }
 0x4bc   :  { %v1429_v49 = vadd.f32 %v1381_v37, %v2669_v7 }
 0x4bd   :  { %v1443_v46 = vpack.c.bf16 %v1431_v48, %v1430_v47 }
 0x4be   :  { %v1991_v50 = vpop.f32.mrb[40].mxu1  ;;  %v1442_v53 = vpack.c.bf16 %v1429_v49, %v1428_v42 }
 0x4bf   :  { %v1402_v51 = vadd.f32 %v1991_v50, %v1717_v59  ;;  %v1393_v33 = vpop.f32.mrb[41].mxu1 }
 0x4c0   :  { %v1394_v52 = vadd.f32 %v1717_v59, %v1393_v33  ;;  %v1992_v55 = vpop.f32.mrb[42].mxu1  ;;  %2017 = vmatprep.mubr.bf16.mxu0 %v1442_v53 }
 0x4c1   :  { %v1405_v56 = vadd.f32 %v1992_v55, %v1717_v59  ;;  %v1396_v57 = vpop.f32.mrb[43].mxu1  ;;  %2018 = vmatmul.mubr.bf16.gmra.mrb[36].mxu0 %v1443_v46  ;;  %v1434_v2 = vadd.f32 %v1402_v51, %v2683_v20 }
 0x4c2   :  { %v1397_v54 = vadd.f32 %v1717_v59, %v1396_v57  ;;  %v1432_v62 = vadd.f32 %v1394_v52, %v2679_v18 }
 0x4c3   :  { %v1435_v6 = vadd.f32 %v1405_v56, %v2686_v21 }
 0x4c4   :  { %v1433_v7 = vadd.f32 %v1397_v54, %v2689_v22 }
 0x4c5   :  { %v1445_v41 = vpack.c.bf16 %v1435_v6, %v1434_v2 }
 0x4c6   :  { %v1995_v29 = vpop.f32.mrb[44].mxu1  ;;  %v1444_v58 = vpack.c.bf16 %v1433_v7, %v1432_v62 }
 0x4c7   :  { %v1418_v43 = vadd.f32 %v1995_v29, %v1717_v59  ;;  %v1409_v44 = vpop.f32.mrb[45].mxu1 }
 0x4c8   :  { %v1410_v60 = vadd.f32 %v1717_v59, %v1409_v44  ;;  %v1996_v45 = vpop.f32.mrb[46].mxu1  ;;  %2021 = vmatprep.mubr.bf16.mxu0 %v1444_v58 }
 0x4c9   :  { %v1421_v61 = vadd.f32 %v1996_v45, %v1717_v59  ;;  %v1412_v63 = vpop.f32.mrb[47].mxu1  ;;  %2022 = vmatmul.mubr.bf16.gmra.mrb[40].mxu0 %v1445_v41  ;;  %v1438_v20 = vadd.f32 %v1418_v43, %v2703_v38 }
 0x4ca   :  { %v1413_v8 = vadd.f32 %v1717_v59, %v1412_v63  ;;  %v1436_v18 = vadd.f32 %v1410_v60, %v2699_v36 }
 0x4cb   :  { %v1439_v21 = vadd.f32 %v1421_v61, %v2706_v39 }
 0x4cc   :  { %v1437_v22 = vadd.f32 %v1413_v8, %v2709_v40 }
 0x4cd   :  { %v1447_v9 = vpack.c.bf16 %v1439_v21, %v1438_v20 }
 0x4ce   :  { %v1446_v1 = vpack.c.bf16 %v1437_v22, %v1436_v18 }
 0x4d0   :  { %2025 = vmatprep.mubr.bf16.mxu0 %v1446_v1 }
 0x4d1   :  { %2026 = vmatmul.mubr.bf16.gmra.mrb[44].mxu0 %v1447_v9 }
 0x58c   :  { %v2015_v12 = vpop.f32.mrb[32].mxu0 }
 0x58d   :  { %v1553_v13 = vpop.f32.mrb[33].mxu0  ;;  %v1562_v4 = vadd.f32 %v2015_v12, %v1726_v10 }
 0x58e   :  { %v2016_v3 = vpop.f32.mrb[34].mxu0  ;;  %v1554_v59 = vadd.f32 %v1726_v10, %v1553_v13 }
 0x58f   :  { %v1556_v14 = vpop.f32.mrb[35].mxu0  ;;  %v1565_v16 = vadd.f32 %v2016_v3, %v1726_v10 }
 0x590   :  { %1616 = vxpose.xlu0.b32.start [1/16] (narrow) %v1554_v59, 8  ;;  %v1557_v38 = vadd.f32 %v1726_v10, %v1556_v14 }
 0x594   :  { %v2019_v39 = vpop.f32.mrb[36].mxu0  ;;  %1617 = vxpose.xlu0.b32.cont [2/16] (narrow) %v1557_v38, 8 }
 0x595   :  { %v1569_v36 = vpop.f32.mrb[37].mxu0  ;;  %v1578_v30 = vadd.f32 %v2019_v39, %v1726_v10 }
 0x596   :  { %v2020_v40 = vpop.f32.mrb[38].mxu0  ;;  %v1570_v19 = vadd.f32 %v1726_v10, %v1569_v36 }
 0x597   :  { %v1572_v15 = vpop.f32.mrb[39].mxu0  ;;  %v1581_v0 = vadd.f32 %v2020_v40, %v1726_v10 }
 0x598   :  { %1618 = vxpose.xlu0.b32.cont [3/16] (narrow) %v1562_v4, 8  ;;  %v1573_v25 = vadd.f32 %v1726_v10, %v1572_v15 }
 0x59c   :  { %v2023_v5 = vpop.f32.mrb[40].mxu0  ;;  %1619 = vxpose.xlu0.b32.cont [4/16] (narrow) %v1565_v16, 8 }
 0x59d   :  { %v1585_v17 = vpop.f32.mrb[41].mxu0  ;;  %v1594_v28 = vadd.f32 %v2023_v5, %v1726_v10 }
 0x59e   :  { %v2024_v11 = vpop.f32.mrb[42].mxu0  ;;  %v1586_v32 = vadd.f32 %v1726_v10, %v1585_v17 }
 0x59f   :  { %v1588_v23 = vpop.f32.mrb[43].mxu0  ;;  %v1597_v35 = vadd.f32 %v2024_v11, %v1726_v10 }
 0x5a0   :  { %1620 = vxpose.xlu0.b32.cont [5/16] (narrow) %v1570_v19, 8  ;;  %v1589_v34 = vadd.f32 %v1726_v10, %v1588_v23 }
 0x5a4   :  { %v2027_v24 = vpop.f32.mrb[44].mxu0  ;;  %1621 = vxpose.xlu0.b32.cont [6/16] (narrow) %v1573_v25, 8 }
 0x5a5   :  { %v1601_v26 = vpop.f32.mrb[45].mxu0  ;;  %v1610_v48 = vadd.f32 %v2027_v24, %v1726_v10 }
 0x5a6   :  { %v2028_v27 = vpop.f32.mrb[46].mxu0  ;;  %v1602_v37 = vadd.f32 %v1726_v10, %v1601_v26 }
 0x5a7   :  { %v1604_v31 = vpop.f32.mrb[47].mxu0  ;;  %v1613_v42 = vadd.f32 %v2028_v27, %v1726_v10 }
 0x5a8   :  { %1622 = vxpose.xlu0.b32.cont [7/16] (narrow) %v1578_v30, 8  ;;  %v1605_v47 = vadd.f32 %v1726_v10, %v1604_v31 }
 0x5ac   :  { %1623 = vxpose.xlu0.b32.cont [8/16] (narrow) %v1581_v0, 8 }
 0x5b0   :  { %1624 = vxpose.xlu0.b32.cont [9/16] (narrow) %v1586_v32, 8 }
 0x5b4   :  { %1625 = vxpose.xlu0.b32.cont [10/16] (narrow) %v1589_v34, 8 }
 0x5b8   :  { %1626 = vxpose.xlu0.b32.cont [11/16] (narrow) %v1594_v28, 8 }
 0x5bc   :  { %1627 = vxpose.xlu0.b32.cont [12/16] (narrow) %v1597_v35, 8 }
 0x5c0   :  { %1628 = vxpose.xlu0.b32.cont [13/16] (narrow) %v1602_v37, 8 }
 0x5c4   :  { %1629 = vxpose.xlu0.b32.cont [14/16] (narrow) %v1605_v47, 8 }
 0x5c8   :  { %1630 = vxpose.xlu0.b32.cont [15/16] (narrow) %v1610_v48, 8 }
 0x5cc   :  { %1631 = vxpose.xlu0.b32.end [16/16] (narrow) %v1613_v42, 8 }
 0x610   :  { %v1632_v49 = vpop.trf.xlu0 }
 0x611   :  { %1648 = vst [vmem:[%s2780_s13] sm:$0xff] %v1632_v49 }
 0x612   :  { %1653 = vsyncpa [#allocation3], 1 }
 0x613   :  { %1654 = vsyncpa [#allocation5], 1 }

</bundles_post_ra>
